<compile_context>
chip_gen: v7x
topology: tpu7x:2x2x1
jax: 0.10.0
libtpu: 0.0.40
codegen_flags: <defaults>
</compile_context>

<pallas_src>
import numpy as np

import jax
import jax.numpy as jnp
from jax import lax
from jax.experimental import pallas as pl
from jax.experimental.pallas import tpu as pltpu


def _round_up(x, m):
    return ((x + m - 1) // m) * m


# ---------------------------------------------------------------------------
# The single fused Pallas kernel (one batch tile of TB rows per grid step)
# ---------------------------------------------------------------------------
def _fused_kernel(img_ref, eps_ref, wconv_ref, bconv_ref,
                  we_ref, be_ref, wml_ref, bml_ref,
                  wd1_ref, bd1_ref, wd2_ref, bd2_ref,
                  x_ref, xr_ref, rec_ref, kl_ref):
    f32 = jnp.float32
    bf16 = jnp.bfloat16

    # backbone: crop + Conv2d(s=2,p=1) + ReLU + ZeroPad2d + [:image_channels]
    # + NCHW flatten, all folded (at init) into ONE bf16 MXU matmul.
    x = jnp.maximum(
        jnp.dot(img_ref[...], wconv_ref[...], preferred_element_type=f32)
        + bconv_ref[...], 0.0)                                      # [TB, D] f32
    x_ref[...] = x

    L = wd1_ref.shape[0]                                            # latent

    # VAE encoder (merged mu|logvar head: one matmul, static lane split)
    h = jnp.maximum(
        jnp.dot(x.astype(bf16), we_ref[...], preferred_element_type=f32)
        + be_ref[...], 0.0)
    ml = jnp.dot(h.astype(bf16), wml_ref[...],
                 preferred_element_type=f32) + bml_ref[...]         # [TB, 2L]
    mu = ml[:, :L]
    logvar = ml[:, L:]

    # reparameterization trick (eps supplied from host RNG)
    std = jnp.exp(0.5 * logvar)        # single EUP pass; reused as var below
    z = mu + eps_ref[...] * std

    # decoder
    h2 = jnp.maximum(
        jnp.dot(z.astype(bf16), wd1_ref[...], preferred_element_type=f32)
        + bd1_ref[...], 0.0)
    x_recon = jnp.dot(h2.astype(bf16), wd2_ref[...],
                      preferred_element_type=f32) + bd2_ref[...]    # [TB, D]
    xr_ref[...] = x_recon

    # per-row loss contributions (mean over batch taken outside; padded rows
    # are simply sliced away, so no in-kernel masking is needed)
    diff = x_recon - x
    rec_ref[...] = jnp.sum(diff * diff, axis=1, keepdims=True)
    var = std * std
    kl_ref[...] = -0.5 * jnp.sum(1.0 + logvar - mu * mu - var,
                                 axis=1, keepdims=True)


def _fused_forward_impl(img, eps, params):
    B = img.shape[0]
    IN = int(np.prod(img.shape[1:]))
    img_flat = img.reshape(B, IN).astype(jnp.bfloat16)     # half-width input DMA

    D = params["wconv"].shape[1]
    L = params["wd1"].shape[0]
    H = params["we"].shape[1]

    TB = min(128, _round_up(B, 8))                          # batch tile
    B_pad = _round_up(B, TB)
    nb = B_pad // TB
    if B_pad != B:
        img_flat = jnp.pad(img_flat, ((0, B_pad - B), (0, 0)))
        eps = jnp.pad(eps, ((0, B_pad - B), (0, 0)))

    weights = (params["wconv"], params["bconv"],
               params["we"], params["be"], params["wml"], params["bml"],
               params["wd1"], params["bd1"], params["wd2"], params["bd2"])

    def batch_block(shape):
        return pl.BlockSpec(shape, lambda i: (i, 0))

    def resident(w):   # full-array block, constant index -> DMA'd once
        return pl.BlockSpec(w.shape, lambda i: (0, 0))

    in_specs = ([batch_block((TB, IN)), batch_block((TB, L))]
                + [resident(w) for w in weights])
    out_specs = (batch_block((TB, D)), batch_block((TB, D)),
                 batch_block((TB, 1)), batch_block((TB, 1)))
    out_shape = (jax.ShapeDtypeStruct((B_pad, D), jnp.float32),   # x
                 jax.ShapeDtypeStruct((B_pad, D), jnp.float32),   # x_recon
                 jax.ShapeDtypeStruct((B_pad, 1), jnp.float32),   # per-row recon
                 jax.ShapeDtypeStruct((B_pad, 1), jnp.float32))   # per-row KL

    flops = 2 * B_pad * (IN * D + D * H + H * 2 * L + L * H + H * D)
    bytes_accessed = (img_flat.size * 2 + eps.size * 4
                      + sum(int(np.prod(w.shape)) * jnp.dtype(w.dtype).itemsize
                            for w in weights)
                      + B_pad * (2 * D + 2) * 4)

    x_pad, xr_pad, rec_rows, kl_rows = pl.pallas_call(
        _fused_kernel,
        grid=(nb,),
        in_specs=in_specs,
        out_specs=out_specs,
        out_shape=out_shape,
        compiler_params=pltpu.CompilerParams(
            dimension_semantics=("parallel",)),
        cost_estimate=pl.CostEstimate(
            flops=flops, transcendentals=B_pad * L,
            bytes_accessed=bytes_accessed),
    )(img_flat, eps, *weights)

    # Loss: sum over features, mean over batch.
    # TODO(synk): the reference VAE loss reduction is config-driven; a mean
    # over all elements (F.mse_loss default) would differ by a factor of D.
    loss_recon = jnp.sum(rec_rows[:B]) / B
    loss_kl = jnp.sum(kl_rows[:B]) / B
    return x_pad[:B], xr_pad[:B], loss_recon, loss_kl


_fused_forward = jax.jit(_fused_forward_impl)


# ---------------------------------------------------------------------------
# Init-time (host, once) construction of the unrolled conv matrix
# ---------------------------------------------------------------------------
def _build_backbone_matrix(conv_w, conv_b, *, in_hw, region, stride, pad):
    """Unrolls crop + Conv2d(k,stride,pad) into [Cin*H*W, Cout*oh*oh] (+bias)."""
    cout, cin, kh, kw = conv_w.shape
    l, r = region if region is not None else (0, in_hw)
    ch = r - l
    oh = (ch + 2 * pad - kh) // stride + 1
    W = np.zeros((cin * in_hw * in_hw, cout * oh * oh), np.float32)
    b = np.zeros((1, cout * oh * oh), np.float32)
    for co in range(cout):
        for oy in range(oh):
            for ox in range(oh):
                k = co * oh * oh + oy * oh + ox
                b[0, k] = conv_b[co]
                for ci in range(cin):
                    for ki in range(kh):
                        for kj in range(kw):
                            yy = stride * oy + ki - pad
                            xx = stride * ox + kj - pad
                            if 0 <= yy < ch and 0 <= xx < ch:
                                i = ci * in_hw * in_hw + (l + yy) * in_hw + (l + xx)
                                W[i, k] += conv_w[co, ci, ki, kj]
    return W, b, oh


def _build_pad_slice_matrix(cout, oh, image_channels, pad):
    """ZeroPad2d(pad) + [:image_channels] + NCHW flatten as a 0/1 matrix."""
    out_h = oh + 2 * pad
    D = image_channels * out_h * out_h
    P = np.zeros((cout * oh * oh, D), np.float32)
    for c in range(image_channels):
        for oy in range(oh):
            for ox in range(oh):
                P[c * oh * oh + oy * oh + ox,
                  c * out_h * out_h + (oy + pad) * out_h + (ox + pad)] = 1.0
    return P


# ---------------------------------------------------------------------------
# InterAutoEncoder forward (single fused kernel per call)
# ---------------------------------------------------------------------------
class InterAutoEncoderPallas:
    def __init__(self, key, *, image_channels=4, padding_size=1,
                 image_region=(2, 14), in_hw=16, backbone_out=8,
                 hidden=32, latent=16):
        self.image_channels = image_channels
        self.padding_size = padding_size
        self.image_region = image_region
        self.latent = latent

        ks = jax.random.split(key, 10)
        s = 0.05
        # synthetic backbone: Conv2d(3, backbone_out, k=3, s=2, p=1) + ReLU
        self.conv_w = s * jax.random.normal(ks[0], (backbone_out, 3, 3, 3), jnp.float32)
        self.conv_b = s * jax.random.normal(ks[1], (backbone_out,), jnp.float32)

        W, b, oh = _build_backbone_matrix(
            np.asarray(self.conv_w), np.asarray(self.conv_b),
            in_hw=in_hw, region=image_region, stride=2, pad=1)
        P = _build_pad_slice_matrix(backbone_out, oh, image_channels, padding_size)
        # Fold ZeroPad2d + channel slice + flatten into the Toeplitz matrix.
        # P is 0/1 with <=1 one per column, so ReLU commutes with it:
        # ReLU(img@W + b) @ P == ReLU(img @ (W@P) + b@P).  Exact.
        W_fused = W @ P
        b_fused = b @ P

        self.out_h = oh + 2 * padding_size
        D = image_channels * self.out_h * self.out_h

        self.params = {
            # MXU weights stored bf16 (f32 accumulate in-kernel); biases f32.
            "wconv": jnp.asarray(W_fused, jnp.bfloat16),
            "bconv": jnp.asarray(b_fused, jnp.float32),
            "we":  (s * jax.random.normal(ks[2], (D, hidden))).astype(jnp.bfloat16),
            "be":   s * jax.random.normal(ks[3], (1, hidden), jnp.float32),
            "wml": (s * jax.random.normal(ks[4], (hidden, 2 * latent))).astype(jnp.bfloat16),
            "bml":  s * jax.random.normal(ks[5], (1, 2 * latent), jnp.float32),
            "wd1": (s * jax.random.normal(ks[6], (latent, hidden))).astype(jnp.bfloat16),
            "bd1":  s * jax.random.normal(ks[7], (1, hidden), jnp.float32),
            "wd2": (s * jax.random.normal(ks[8], (hidden, D))).astype(jnp.bfloat16),
            "bd2":  s * jax.random.normal(ks[9], (1, D), jnp.float32),
        }

    def forward(self, img, mode="train", *, rng=None, seed=0):
        if rng is None:
            rng = jax.random.PRNGKey(seed)
        B = img.shape[0]
        eps = jax.random.normal(rng, (B, self.latent), jnp.float32)
        x, x_recon, loss_recon, loss_kl = _fused_forward(img, eps, self.params)
        if mode == "train":
            return {"loss_recon": loss_recon,
                    "loss_kl": loss_kl,
                    "loss": loss_recon + loss_kl}
        elif mode == "recon":
            # TODO(synk): eval-time sampling behavior (mu-only vs sampled z) is
            # config-driven in the reference VAE; recon decodes sampled z here.
            shape = (B, self.image_channels, self.out_h, self.out_h)
            return {"x": x.reshape(shape), "x_recon": x_recon.reshape(shape)}
        else:
            raise Exception("No such mode: {}".format(mode))


# ---------------------------------------------------------------------------
# pure-JAX reference for get_inter_x (sanity check of the folded matrix)
# ---------------------------------------------------------------------------
def _reference_inter_x(img, conv_w, conv_b, region, image_channels, pad_size):
    if region is not None:
        l, r = region
        img = img[:, :, l:r, l:r]
    out = lax.conv_general_dilated(
        img, conv_w, window_strides=(2, 2), padding=[(1, 1), (1, 1)],
        dimension_numbers=("NCHW", "OIHW", "NCHW"))
    out = jnp.maximum(out + conv_b.reshape(1, -1, 1, 1), 0.0)
    out = jnp.pad(out, ((0, 0), (0, 0), (pad_size, pad_size), (pad_size, pad_size)))
    return out[:, :image_channels]


if __name__ == "__main__":
    key = jax.random.PRNGKey(0)
    k_param, k_img, k_eps = jax.random.split(key, 3)

    model = InterAutoEncoderPallas(k_param)

    # img [B=2, 3, 16, 16]; crop (2,14) -> 12x12, conv s2 p1 -> 6x6,
    # ZeroPad2d(1) -> 8x8, slice to 4 channels -> VAE input [2, 4, 8, 8].
    img = jax.random.normal(k_img, (2, 3, 16, 16), jnp.float32)

    train_out = model.forward(img, mode="train", rng=k_eps)
    recon_out = model.forward(img, mode="recon", rng=k_eps)

    jax.block_until_ready(train_out["loss"])
    jax.block_until_ready(recon_out["x_recon"])

    assert recon_out["x"].shape == (2, 4, 8, 8)
    assert recon_out["x_recon"].shape == (2, 4, 8, 8)
    assert bool(jnp.isfinite(train_out["loss"]))

    # cross-check the fused backbone/pad/slice path (bf16 MXU -> loose tol)
    x_ref = _reference_inter_x(img, model.conv_w, model.conv_b,
                               model.image_region, model.image_channels,
                               model.padding_size)
    assert jnp.allclose(recon_out["x"], x_ref, atol=5e-2, rtol=5e-2), (
        float(jnp.max(jnp.abs(recon_out["x"] - x_ref))))

    print("KERNEL_OK")
</pallas_src>

<mosaic_0001>
module attributes {stable_mosaic.version = 11 : i64} {
  func.func @_fused_kernel(%arg0: i32, %arg1: memref<8x768xbf16, #tpu.memory_space<vmem>>, %arg2: memref<8x16xf32, #tpu.memory_space<vmem>>, %arg3: memref<768x256xbf16, #tpu.memory_space<vmem>>, %arg4: memref<1x256xf32, #tpu.memory_space<vmem>>, %arg5: memref<256x32xbf16, #tpu.memory_space<vmem>>, %arg6: memref<1x32xf32, #tpu.memory_space<vmem>>, %arg7: memref<32x32xbf16, #tpu.memory_space<vmem>>, %arg8: memref<1x32xf32, #tpu.memory_space<vmem>>, %arg9: memref<16x32xbf16, #tpu.memory_space<vmem>>, %arg10: memref<1x32xf32, #tpu.memory_space<vmem>>, %arg11: memref<32x256xbf16, #tpu.memory_space<vmem>>, %arg12: memref<1x256xf32, #tpu.memory_space<vmem>>, %arg13: memref<8x256xf32, #tpu.memory_space<vmem>>, %arg14: memref<8x256xf32, #tpu.memory_space<vmem>>, %arg15: memref<8x1xf32, #tpu.memory_space<vmem>>, %arg16: memref<8x1xf32, #tpu.memory_space<vmem>>) attributes {dimension_semantics = [#tpu.dimension_semantics<parallel>], iteration_bounds = array<i64: 1>, scalar_prefetch = 0 : i64, scratch_operands = 0 : i64, tpu.core_type = #tpu.core_type<tc>, window_params = [{transform_indices = @transform_0, window_bounds = array<i64: 8, 768>}, {transform_indices = @transform_1, window_bounds = array<i64: 8, 16>}, {pipeline_mode = #tpu.pipeline_mode<synchronous>, transform_indices = @transform_2, window_bounds = array<i64: 768, 256>}, {pipeline_mode = #tpu.pipeline_mode<synchronous>, transform_indices = @transform_3, window_bounds = array<i64: 1, 256>}, {pipeline_mode = #tpu.pipeline_mode<synchronous>, transform_indices = @transform_4, window_bounds = array<i64: 256, 32>}, {pipeline_mode = #tpu.pipeline_mode<synchronous>, transform_indices = @transform_5, window_bounds = array<i64: 1, 32>}, {pipeline_mode = #tpu.pipeline_mode<synchronous>, transform_indices = @transform_6, window_bounds = array<i64: 32, 32>}, {pipeline_mode = #tpu.pipeline_mode<synchronous>, transform_indices = @transform_7, window_bounds = array<i64: 1, 32>}, {pipeline_mode = #tpu.pipeline_mode<synchronous>, transform_indices = @transform_8, window_bounds = array<i64: 16, 32>}, {pipeline_mode = #tpu.pipeline_mode<synchronous>, transform_indices = @transform_9, window_bounds = array<i64: 1, 32>}, {pipeline_mode = #tpu.pipeline_mode<synchronous>, transform_indices = @transform_10, window_bounds = array<i64: 32, 256>}, {pipeline_mode = #tpu.pipeline_mode<synchronous>, transform_indices = @transform_11, window_bounds = array<i64: 1, 256>}, {transform_indices = @transform_12, window_bounds = array<i64: 8, 256>}, {transform_indices = @transform_13, window_bounds = array<i64: 8, 256>}, {transform_indices = @transform_14, window_bounds = array<i64: 8, 1>}, {transform_indices = @transform_15, window_bounds = array<i64: 8, 1>}]} {
    %c0 = arith.constant 0 : index
    %c0_0 = arith.constant 0 : index
    %0 = vector.load %arg1[%c0, %c0_0] : memref<8x768xbf16, #tpu.memory_space<vmem>>, vector<8x768xbf16>
    %c0_1 = arith.constant 0 : index
    %c0_2 = arith.constant 0 : index
    %1 = vector.load %arg3[%c0_1, %c0_2] : memref<768x256xbf16, #tpu.memory_space<vmem>>, vector<768x256xbf16>
    %cst = arith.constant dense<0.000000e+00> : vector<8x256xf32>
    %2 = tpu.matmul %0, %1, %cst {dimension_numbers = #tpu.dot_dimension_numbers<[1], [0], [0], [1], [0, 0, 1, 1], [], []>} : vector<8x768xbf16>, vector<768x256xbf16>, vector<8x256xf32> -> vector<8x256xf32>
    %c0_3 = arith.constant 0 : index
    %c0_4 = arith.constant 0 : index
    %3 = vector.load %arg4[%c0_3, %c0_4] : memref<1x256xf32, #tpu.memory_space<vmem>>, vector<1x256xf32>
    %4 = vector.broadcast %3 : vector<1x256xf32> to vector<8x256xf32>
    %5 = arith.addf %2, %4 : vector<8x256xf32>
    %cst_5 = arith.constant 0.000000e+00 : f32
    %6 = vector.broadcast %cst_5 : f32 to vector<8x256xf32>
    %7 = arith.maximumf %5, %6 : vector<8x256xf32>
    %c0_6 = arith.constant 0 : index
    %c0_7 = arith.constant 0 : index
    %8 = vector.load %arg13[%c0_6, %c0_7] : memref<8x256xf32, #tpu.memory_space<vmem>>, vector<8x256xf32>
    tpu.vector_store %arg13[%c0_6, %c0_7], %7 {strides = array<i32>} : memref<8x256xf32, #tpu.memory_space<vmem>>, vector<8x256xf32>,
    %9 = arith.truncf %7 : vector<8x256xf32> to vector<8x256xbf16>
    %c0_8 = arith.constant 0 : index
    %c0_9 = arith.constant 0 : index
    %10 = vector.load %arg5[%c0_8, %c0_9] : memref<256x32xbf16, #tpu.memory_space<vmem>>, vector<256x32xbf16>
    %cst_10 = arith.constant dense<0.000000e+00> : vector<8x32xf32>
    %11 = tpu.matmul %9, %10, %cst_10 {dimension_numbers = #tpu.dot_dimension_numbers<[1], [0], [0], [1], [0, 0, 1, 1], [], []>} : vector<8x256xbf16>, vector<256x32xbf16>, vector<8x32xf32> -> vector<8x32xf32>
    %c0_11 = arith.constant 0 : index
    %c0_12 = arith.constant 0 : index
    %12 = vector.load %arg6[%c0_11, %c0_12] : memref<1x32xf32, #tpu.memory_space<vmem>>, vector<1x32xf32>
    %13 = vector.broadcast %12 : vector<1x32xf32> to vector<8x32xf32>
    %14 = arith.addf %11, %13 : vector<8x32xf32>
    %cst_13 = arith.constant 0.000000e+00 : f32
    %15 = vector.broadcast %cst_13 : f32 to vector<8x32xf32>
    %16 = arith.maximumf %14, %15 : vector<8x32xf32>
    %17 = arith.truncf %16 : vector<8x32xf32> to vector<8x32xbf16>
    %c0_14 = arith.constant 0 : index
    %c0_15 = arith.constant 0 : index
    %18 = vector.load %arg7[%c0_14, %c0_15] : memref<32x32xbf16, #tpu.memory_space<vmem>>, vector<32x32xbf16>
    %cst_16 = arith.constant dense<0.000000e+00> : vector<8x32xf32>
    %19 = tpu.matmul %17, %18, %cst_16 {dimension_numbers = #tpu.dot_dimension_numbers<[1], [0], [0], [1], [0, 0, 1, 1], [], []>} : vector<8x32xbf16>, vector<32x32xbf16>, vector<8x32xf32> -> vector<8x32xf32>
    %c0_17 = arith.constant 0 : index
    %c0_18 = arith.constant 0 : index
    %20 = vector.load %arg8[%c0_17, %c0_18] : memref<1x32xf32, #tpu.memory_space<vmem>>, vector<1x32xf32>
    %21 = vector.broadcast %20 : vector<1x32xf32> to vector<8x32xf32>
    %22 = arith.addf %19, %21 : vector<8x32xf32>
    %23 = vector.extract_strided_slice %22 {offsets = [0, 0], sizes = [8, 16], strides = [1, 1]} : vector<8x32xf32> to vector<8x16xf32>
    %24 = vector.extract_strided_slice %22 {offsets = [0, 16], sizes = [8, 16], strides = [1, 1]} : vector<8x32xf32> to vector<8x16xf32>
    %cst_19 = arith.constant 5.000000e-01 : f32
    %25 = vector.broadcast %cst_19 : f32 to vector<8x16xf32>
    %26 = arith.mulf %25, %24 : vector<8x16xf32>
    %27 = math.exp %26 : vector<8x16xf32>
    %c0_20 = arith.constant 0 : index
    %c0_21 = arith.constant 0 : index
    %28 = vector.load %arg2[%c0_20, %c0_21] : memref<8x16xf32, #tpu.memory_space<vmem>>, vector<8x16xf32>
    %29 = arith.mulf %28, %27 : vector<8x16xf32>
    %30 = arith.addf %23, %29 : vector<8x16xf32>
    %31 = arith.truncf %30 : vector<8x16xf32> to vector<8x16xbf16>
    %c0_22 = arith.constant 0 : index
    %c0_23 = arith.constant 0 : index
    %32 = vector.load %arg9[%c0_22, %c0_23] : memref<16x32xbf16, #tpu.memory_space<vmem>>, vector<16x32xbf16>
    %cst_24 = arith.constant dense<0.000000e+00> : vector<8x32xf32>
    %33 = tpu.matmul %31, %32, %cst_24 {dimension_numbers = #tpu.dot_dimension_numbers<[1], [0], [0], [1], [0, 0, 1, 1], [], []>} : vector<8x16xbf16>, vector<16x32xbf16>, vector<8x32xf32> -> vector<8x32xf32>
    %c0_25 = arith.constant 0 : index
    %c0_26 = arith.constant 0 : index
    %34 = vector.load %arg10[%c0_25, %c0_26] : memref<1x32xf32, #tpu.memory_space<vmem>>, vector<1x32xf32>
    %35 = vector.broadcast %34 : vector<1x32xf32> to vector<8x32xf32>
    %36 = arith.addf %33, %35 : vector<8x32xf32>
    %cst_27 = arith.constant 0.000000e+00 : f32
    %37 = vector.broadcast %cst_27 : f32 to vector<8x32xf32>
    %38 = arith.maximumf %36, %37 : vector<8x32xf32>
    %39 = arith.truncf %38 : vector<8x32xf32> to vector<8x32xbf16>
    %c0_28 = arith.constant 0 : index
    %c0_29 = arith.constant 0 : index
    %40 = vector.load %arg11[%c0_28, %c0_29] : memref<32x256xbf16, #tpu.memory_space<vmem>>, vector<32x256xbf16>
    %cst_30 = arith.constant dense<0.000000e+00> : vector<8x256xf32>
    %41 = tpu.matmul %39, %40, %cst_30 {dimension_numbers = #tpu.dot_dimension_numbers<[1], [0], [0], [1], [0, 0, 1, 1], [], []>} : vector<8x32xbf16>, vector<32x256xbf16>, vector<8x256xf32> -> vector<8x256xf32>
    %c0_31 = arith.constant 0 : index
    %c0_32 = arith.constant 0 : index
    %42 = vector.load %arg12[%c0_31, %c0_32] : memref<1x256xf32, #tpu.memory_space<vmem>>, vector<1x256xf32>
    %43 = vector.broadcast %42 : vector<1x256xf32> to vector<8x256xf32>
    %44 = arith.addf %41, %43 : vector<8x256xf32>
    %c0_33 = arith.constant 0 : index
    %c0_34 = arith.constant 0 : index
    %45 = vector.load %arg14[%c0_33, %c0_34] : memref<8x256xf32, #tpu.memory_space<vmem>>, vector<8x256xf32>
    tpu.vector_store %arg14[%c0_33, %c0_34], %44 {strides = array<i32>} : memref<8x256xf32, #tpu.memory_space<vmem>>, vector<8x256xf32>,
    %46 = arith.subf %44, %7 : vector<8x256xf32>
    %47 = arith.mulf %46, %46 : vector<8x256xf32>
    %cst_35 = arith.constant dense<0.000000e+00> : vector<8xf32>
    %48 = vector.multi_reduction <add>, %47, %cst_35 [1] : vector<8x256xf32> to vector<8xf32>
    %49 = vector.shape_cast %48 : vector<8xf32> to vector<8x1xf32>
    %c0_36 = arith.constant 0 : index
    %c0_37 = arith.constant 0 : index
    %50 = vector.load %arg15[%c0_36, %c0_37] : memref<8x1xf32, #tpu.memory_space<vmem>>, vector<8x1xf32>
    tpu.vector_store %arg15[%c0_36, %c0_37], %49 {strides = array<i32>} : memref<8x1xf32, #tpu.memory_space<vmem>>, vector<8x1xf32>,
    %51 = arith.mulf %27, %27 : vector<8x16xf32>
    %cst_38 = arith.constant 1.000000e+00 : f32
    %52 = vector.broadcast %cst_38 : f32 to vector<8x16xf32>
    %53 = arith.addf %52, %24 : vector<8x16xf32>
    %54 = arith.mulf %23, %23 : vector<8x16xf32>
    %55 = arith.subf %53, %54 : vector<8x16xf32>
    %56 = arith.subf %55, %51 : vector<8x16xf32>
    %cst_39 = arith.constant dense<0.000000e+00> : vector<8xf32>
    %57 = vector.multi_reduction <add>, %56, %cst_39 [1] : vector<8x16xf32> to vector<8xf32>
    %58 = vector.shape_cast %57 : vector<8xf32> to vector<8x1xf32>
    %cst_40 = arith.constant -5.000000e-01 : f32
    %59 = vector.broadcast %cst_40 : f32 to vector<8x1xf32>
    %60 = arith.mulf %59, %58 : vector<8x1xf32>
    %c0_41 = arith.constant 0 : index
    %c0_42 = arith.constant 0 : index
    %61 = vector.load %arg16[%c0_41, %c0_42] : memref<8x1xf32, #tpu.memory_space<vmem>>, vector<8x1xf32>
    tpu.vector_store %arg16[%c0_41, %c0_42], %60 {strides = array<i32>} : memref<8x1xf32, #tpu.memory_space<vmem>>, vector<8x1xf32>,
    return
  }
  func.func @transform_0(%arg0: i32) -> (i32, i32) {
    %c0_i32 = arith.constant 0 : i32
    %c0_i32_0 = arith.constant 0 : i32
    return %arg0, %c0_i32 : i32, i32
  }
  func.func @transform_1(%arg0: i32) -> (i32, i32) {
    %c0_i32 = arith.constant 0 : i32
    %c0_i32_0 = arith.constant 0 : i32
    return %arg0, %c0_i32 : i32, i32
  }
  func.func @transform_2(%arg0: i32) -> (i32, i32) {
    %c0_i32 = arith.constant 0 : i32
    %c0_i32_0 = arith.constant 0 : i32
    %c0_i32_1 = arith.constant 0 : i32
    return %c0_i32, %c0_i32_0 : i32, i32
  }
  func.func @transform_3(%arg0: i32) -> (i32, i32) {
    %c0_i32 = arith.constant 0 : i32
    %c0_i32_0 = arith.constant 0 : i32
    %c0_i32_1 = arith.constant 0 : i32
    return %c0_i32, %c0_i32_0 : i32, i32
  }
  func.func @transform_4(%arg0: i32) -> (i32, i32) {
    %c0_i32 = arith.constant 0 : i32
    %c0_i32_0 = arith.constant 0 : i32
    %c0_i32_1 = arith.constant 0 : i32
    return %c0_i32, %c0_i32_0 : i32, i32
  }
  func.func @transform_5(%arg0: i32) -> (i32, i32) {
    %c0_i32 = arith.constant 0 : i32
    %c0_i32_0 = arith.constant 0 : i32
    %c0_i32_1 = arith.constant 0 : i32
    return %c0_i32, %c0_i32_0 : i32, i32
  }
  func.func @transform_6(%arg0: i32) -> (i32, i32) {
    %c0_i32 = arith.constant 0 : i32
    %c0_i32_0 = arith.constant 0 : i32
    %c0_i32_1 = arith.constant 0 : i32
    return %c0_i32, %c0_i32_0 : i32, i32
  }
  func.func @transform_7(%arg0: i32) -> (i32, i32) {
    %c0_i32 = arith.constant 0 : i32
    %c0_i32_0 = arith.constant 0 : i32
    %c0_i32_1 = arith.constant 0 : i32
    return %c0_i32, %c0_i32_0 : i32, i32
  }
  func.func @transform_8(%arg0: i32) -> (i32, i32) {
    %c0_i32 = arith.constant 0 : i32
    %c0_i32_0 = arith.constant 0 : i32
    %c0_i32_1 = arith.constant 0 : i32
    return %c0_i32, %c0_i32_0 : i32, i32
  }
  func.func @transform_9(%arg0: i32) -> (i32, i32) {
    %c0_i32 = arith.constant 0 : i32
    %c0_i32_0 = arith.constant 0 : i32
    %c0_i32_1 = arith.constant 0 : i32
    return %c0_i32, %c0_i32_0 : i32, i32
  }
  func.func @transform_10(%arg0: i32) -> (i32, i32) {
    %c0_i32 = arith.constant 0 : i32
    %c0_i32_0 = arith.constant 0 : i32
    %c0_i32_1 = arith.constant 0 : i32
    return %c0_i32, %c0_i32_0 : i32, i32
  }
  func.func @transform_11(%arg0: i32) -> (i32, i32) {
    %c0_i32 = arith.constant 0 : i32
    %c0_i32_0 = arith.constant 0 : i32
    %c0_i32_1 = arith.constant 0 : i32
    return %c0_i32, %c0_i32_0 : i32, i32
  }
  func.func @transform_12(%arg0: i32) -> (i32, i32) {
    %c0_i32 = arith.constant 0 : i32
    %c0_i32_0 = arith.constant 0 : i32
    return %arg0, %c0_i32 : i32, i32
  }
  func.func @transform_13(%arg0: i32) -> (i32, i32) {
    %c0_i32 = arith.constant 0 : i32
    %c0_i32_0 = arith.constant 0 : i32
    return %arg0, %c0_i32 : i32, i32
  }
  func.func @transform_14(%arg0: i32) -> (i32, i32) {
    %c0_i32 = arith.constant 0 : i32
    %c0_i32_0 = arith.constant 0 : i32
    return %arg0, %c0_i32 : i32, i32
  }
  func.func @transform_15(%arg0: i32) -> (i32, i32) {
    %c0_i32 = arith.constant 0 : i32
    %c0_i32_0 = arith.constant 0 : i32
    return %arg0, %c0_i32 : i32, i32
  }
}

</mosaic_0001>

<bundles_post_ra>
// kernel: _fused_forward_impl.1
= control target key start
LH: loop header
LB: loop body
LE: loop exit
PB: predicated region body
PF: predicated region fallthrough
CT: control target
= control target key end

     0   :  { %21 = vsyncpa [#allocation3], 0  ;;  %s1632_s18 = smov [#allocation2]   ;;  %s1888_s0 = inlined_call_operand.vmem [shape: bf16[8,768], index: 0, kind: input, shape index: {}]   ;;  %s1889_s1 = inlined_call_operand.vmem [shape: f32[8,16], index: 1, kind: input, shape index: {}]   ;;  %s1890_s2 = inlined_call_operand.hbm [shape: bf16[768,256], index: 2, kind: input, shape index: {}]   ;;  %s1891_s3 = inlined_call_operand.vmem [shape: f32[1,256], index: 3, kind: input, shape index: {}]   ;;  %s1892_s4 = inlined_call_operand.vmem [shape: bf16[256,32], index: 4, kind: input, shape index: {}]   ;;  %s1893_s5 = inlined_call_operand.vmem [shape: f32[1,32], index: 5, kind: input, shape index: {}]   ;;  %s1894_s6 = inlined_call_operand.vmem [shape: bf16[32,32], index: 6, kind: input, shape index: {}]   ;;  %s1895_s7 = inlined_call_operand.vmem [shape: f32[1,32], index: 7, kind: input, shape index: {}]   ;;  %s1896_s8 = inlined_call_operand.vmem [shape: bf16[16,32], index: 8, kind: input, shape index: {}]   ;;  %s1897_s9 = inlined_call_operand.vmem [shape: f32[1,32], index: 9, kind: input, shape index: {}]   ;;  %s1898_s10 = inlined_call_operand.vmem [shape: bf16[32,256], index: 10, kind: input, shape index: {}]   ;;  %s1899_s11 = inlined_call_operand.vmem [shape: f32[1,256], index: 11, kind: input, shape index: {}]   ;;  %s1900_s12 = inlined_call_operand.vmem [shape: f32[8,256], index: 12, kind: output, shape index: {0}]   ;;  %s1901_s13 = inlined_call_operand.vmem [shape: f32[8,256], index: 13, kind: output, shape index: {1}]   ;;  %s1902_s14 = inlined_call_operand.vmem [shape: f32[8,1], index: 14, kind: output, shape index: {2}]   ;;  %s1903_s15 = inlined_call_operand.vmem [shape: f32[8,1], index: 15, kind: output, shape index: {3}]  }
   0x1   :  { %s31_s19 = sshll.u32 %s1632_s18, 4  ;;  %s1608_s22 = scalar_lea.hbm %s1890_s2, 12288  ;;  %s32_s19 = int_to_ptr.vmem [resolvable:$true] %s31_s19 }
   0x2   :  { %p1609_p0 = scmp.ne.s32.totalorder %s1890_s2, %s1608_s22  ;;  %p1612_p1 = scmp.lt.u32.totalorder %s1608_s22, %s1890_s2 }
   0x4   :  { %p1614_p2 = pnand %p1612_p1, %p1609_p0 }
   0x6   :  { %1617 = shalt.err (!%p1614_p2)
}
   0x7   :  { %s1618_s27 = scalar_lea.vmem %s32_s19, 12288  ;;  %p1623_p4 = scmp.lt.s32.totalorder %s32_s19, %s32_s19 }
   0x8   :  { %p1619_p3 = scmp.ne.s32.totalorder %s32_s19, %s1618_s27  ;;  %p1624_p5 = scmp.lt.s32.totalorder %s1618_s27, %s1618_s27 }
   0xa   :  { %p1625_p6 = por %p1624_p5, %p1623_p4 }
   0xc   :  { %p1626_p7 = pnand %p1625_p6, %p1619_p3 }
   0xe   :  { %1629 = shalt.err (!%p1626_p7)
}
   0xf   :  { %s1633_s28 = smov 128   ;;  %s1634_s29 = smov 8  }
  0x10   :  { %37 = dma.hbm_to_vmem [thread:$0]  %s1890_s2, 12288, %s32_s19, [#allocation3], %s1633_s28, %s1633_s28, %s1634_s29  }
  0x11   :  { %1630 = dma.done.wait [#allocation3], 12288  }
  0x12   :  { %1631 = vsyncadd [#allocation3], 4294955008  ;;  %v1431_v0 = vld [vmem:[#allocation2 + $0x104] ss:$8 sps:$4 sm:$0xff]   ;;  %v1433_v1 = vld [vmem:[#allocation2 + $0x100] ss:$8 sps:$4 sm:$0xff]  }
  0x13   :  { %713 = vmatprep.subr.bf16.mxu0 %v1431_v0  ;;  %v1434_v2 = vld [vmem:[#allocation2 + $0x114] ss:$8 sps:$4 sm:$0xff]   ;;  %v1436_v3 = vld [vmem:[#allocation2 + $0x110] ss:$8 sps:$4 sm:$0xff]   ;;  %v1437_v4 = vld [vmem:[#allocation2 + $0x124] ss:$8 sps:$4 sm:$0xff]  }
  0x14   :  { %714 = vmatpush1.bf16.msra.mxu0 %v1433_v1  ;;  %v1439_v5 = vld [vmem:[#allocation2 + $0x120] ss:$8 sps:$4 sm:$0xff]   ;;  %v1440_v6 = vld [vmem:[#allocation2 + $0x134] ss:$8 sps:$4 sm:$0xff]   ;;  %v1442_v7 = vld [vmem:[#allocation2 + $0x130] ss:$8 sps:$4 sm:$0xff]  }
  0x15   :  { %715 = vmatprep.subr.bf16.mxu0 %v1434_v2  ;;  %v1443_v8 = vld [vmem:[#allocation2 + $0x144] ss:$8 sps:$4 sm:$0xff]   ;;  %v1445_v9 = vld [vmem:[#allocation2 + $0x140] ss:$8 sps:$4 sm:$0xff]   ;;  %v1446_v10 = vld [vmem:[#allocation2 + $0x154] ss:$8 sps:$4 sm:$0xff]  }
  0x16   :  { %v1448_v11 = vld [vmem:[#allocation2 + $0x150] ss:$8 sps:$4 sm:$0xff]   ;;  %v1449_v12 = vld [vmem:[#allocation2 + $0x164] ss:$8 sps:$4 sm:$0xff]   ;;  %v1478_v14 = vld [vmem:[#allocation2] ss:$8 sps:$4 sm:$0xff]  }
  0x17   :  { %v1476_v13 = vld [vmem:[#allocation2 + $0x4] ss:$8 sps:$4 sm:$0xff]   ;;  %v1451_v15 = vld [vmem:[#allocation2 + $0x160] ss:$8 sps:$4 sm:$0xff]   ;;  %v1452_v16 = vld [vmem:[#allocation2 + $0x174] ss:$8 sps:$4 sm:$0xff]  }
  0x18   :  { %716 = vmatpush1.bf16.msra.mxu0 %v1436_v3  ;;  %672 = vmatprep.subr.bf16.mxu1 %v1476_v13  ;;  %v1482_v17 = vld [vmem:[#allocation2 + $0x14] ss:$8 sps:$4 sm:$0xff]   ;;  %v1484_v18 = vld [vmem:[#allocation2 + $0x10] ss:$8 sps:$4 sm:$0xff]   ;;  %v1735_v19 = vld [vmem:[%s1888_s0 + $0x8] sm:$0xff]  ;;  %vm1636_vm0 = vmmov 0  }
  0x19   :  { %717 = vmatprep.subr.bf16.mxu0 %v1437_v4  ;;  %673 = vmatpush1.bf16.msra.mxu1 %v1478_v14  ;;  %v1246_v20 = vcombine.high %v1735_v19, %v1735_v19  ;;  %v1454_v21 = vld [vmem:[#allocation2 + $0x170] ss:$8 sps:$4 sm:$0xff]   ;;  %v1490_v22 = vld [vmem:[#allocation2 + $0x24] ss:$8 sps:$4 sm:$0xff]   ;;  %v1492_v23 = vld [vmem:[#allocation2 + $0x20] ss:$8 sps:$4 sm:$0xff]   ;;  %v1245_v58 = vcombine.low %v1735_v19, %v1735_v19 }
  0x1a   :  { %674 = vmatprep.subr.bf16.mxu1 %v1482_v17  ;;  %v1455_v24 = vld [vmem:[#allocation2 + $0x184] ss:$8 sps:$4 sm:$0xff]   ;;  %v1496_v25 = vld [vmem:[#allocation2 + $0x34] ss:$8 sps:$4 sm:$0xff]   ;;  %v1457_v26 = vld [vmem:[#allocation2 + $0x180] ss:$8 sps:$4 sm:$0xff]  }
  0x1b   :  { %745 = vmatprep.mubr.bf16.mxu0 %v1246_v20  ;;  %v1458_v27 = vld [vmem:[#allocation2 + $0x194] ss:$8 sps:$4 sm:$0xff]   ;;  %v1498_v28 = vld [vmem:[#allocation2 + $0x30] ss:$8 sps:$4 sm:$0xff]   ;;  %v1502_v29 = vld [vmem:[#allocation2 + $0x44] ss:$8 sps:$4 sm:$0xff]  }
  0x1c   :  { %718 = vmatpush1.bf16.msra.mxu0 %v1439_v5  ;;  %v1460_v30 = vld [vmem:[#allocation2 + $0x190] ss:$8 sps:$4 sm:$0xff]   ;;  %v1461_v31 = vld [vmem:[#allocation2 + $0x1a4] ss:$8 sps:$4 sm:$0xff]   ;;  %v1504_v32 = vld [vmem:[#allocation2 + $0x40] ss:$8 sps:$4 sm:$0xff]  }
  0x1d   :  { %719 = vmatprep.subr.bf16.mxu0 %v1440_v6  ;;  %675 = vmatpush1.bf16.msra.mxu1 %v1484_v18  ;;  %v1508_v33 = vld [vmem:[#allocation2 + $0x54] ss:$8 sps:$4 sm:$0xff]   ;;  %v1463_v34 = vld [vmem:[#allocation2 + $0x1a0] ss:$8 sps:$4 sm:$0xff]   ;;  %v1510_v36 = vld [vmem:[#allocation2 + $0x50] ss:$8 sps:$4 sm:$0xff]  }
  0x1e   :  { %676 = vmatprep.subr.bf16.mxu1 %v1490_v22  ;;  %v1464_v35 = vld [vmem:[#allocation2 + $0x1b4] ss:$8 sps:$4 sm:$0xff]   ;;  %v1514_v37 = vld [vmem:[#allocation2 + $0x64] ss:$8 sps:$4 sm:$0xff]   ;;  %v1466_v38 = vld [vmem:[#allocation2 + $0x1b0] ss:$8 sps:$4 sm:$0xff]  }
  0x1f   :  { %v1467_v39 = vld [vmem:[#allocation2 + $0x1c4] ss:$8 sps:$4 sm:$0xff]   ;;  %v1516_v40 = vld [vmem:[#allocation2 + $0x60] ss:$8 sps:$4 sm:$0xff]   ;;  %v1520_v41 = vld [vmem:[#allocation2 + $0x74] ss:$8 sps:$4 sm:$0xff]  }
  0x20   :  { %720 = vmatpush1.bf16.msra.mxu0 %v1442_v7  ;;  %v1469_v42 = vld [vmem:[#allocation2 + $0x1c0] ss:$8 sps:$4 sm:$0xff]   ;;  %v1470_v43 = vld [vmem:[#allocation2 + $0x1d4] ss:$8 sps:$4 sm:$0xff]   ;;  %v1522_v44 = vld [vmem:[#allocation2 + $0x70] ss:$8 sps:$4 sm:$0xff]  }
  0x21   :  { %721 = vmatprep.subr.bf16.mxu0 %v1443_v8  ;;  %677 = vmatpush1.bf16.msra.mxu1 %v1492_v23  ;;  %v1526_v45 = vld [vmem:[#allocation2 + $0x84] ss:$8 sps:$4 sm:$0xff]   ;;  %v1472_v46 = vld [vmem:[#allocation2 + $0x1d0] ss:$8 sps:$4 sm:$0xff]   ;;  %v1528_v48 = vld [vmem:[#allocation2 + $0x80] ss:$8 sps:$4 sm:$0xff]  }
  0x22   :  { %678 = vmatprep.subr.bf16.mxu1 %v1496_v25  ;;  %v1473_v47 = vld [vmem:[#allocation2 + $0x1e4] ss:$8 sps:$4 sm:$0xff]   ;;  %v1532_v49 = vld [vmem:[#allocation2 + $0x94] ss:$8 sps:$4 sm:$0xff]   ;;  %v1475_v50 = vld [vmem:[#allocation2 + $0x1e0] ss:$8 sps:$4 sm:$0xff]  }
  0x23   :  { %v1479_v51 = vld [vmem:[#allocation2 + $0x1f4] ss:$8 sps:$4 sm:$0xff]   ;;  %v1534_v52 = vld [vmem:[#allocation2 + $0x90] ss:$8 sps:$4 sm:$0xff]   ;;  %v1538_v53 = vld [vmem:[#allocation2 + $0xa4] ss:$8 sps:$4 sm:$0xff]  }
  0x24   :  { %722 = vmatpush1.bf16.msra.mxu0 %v1445_v9  ;;  %v1481_v54 = vld [vmem:[#allocation2 + $0x1f0] ss:$8 sps:$4 sm:$0xff]   ;;  %v1489_v55 = vld [vmem:[#allocation2 + $0x204] ss:$8 sps:$4 sm:$0xff]   ;;  %v1540_v56 = vld [vmem:[#allocation2 + $0xa0] ss:$8 sps:$4 sm:$0xff]  }
  0x25   :  { %723 = vmatprep.subr.bf16.mxu0 %v1446_v10  ;;  %679 = vmatpush1.bf16.msra.mxu1 %v1498_v28  ;;  %v1544_v57 = vld [vmem:[#allocation2 + $0xb4] ss:$8 sps:$4 sm:$0xff]   ;;  %v1487_v59 = vld [vmem:[#allocation2 + $0x200] ss:$8 sps:$4 sm:$0xff]   ;;  %v1546_v60 = vld [vmem:[#allocation2 + $0xb0] ss:$8 sps:$4 sm:$0xff]  }
  0x26   :  { %680 = vmatprep.subr.bf16.mxu1 %v1502_v29  ;;  %v60_v61 = vld [vmem:[%s1888_s0] sm:$0xff]  ;;  %v1495_v62 = vld [vmem:[#allocation2 + $0x214] ss:$8 sps:$4 sm:$0xff]   ;;  %v1493_v2 = vld [vmem:[#allocation2 + $0x210] ss:$8 sps:$4 sm:$0xff]   ;;  %vm1001_vm1 = vcmask 261120  }
  0x27   :  { %v1550_v63 = vld [vmem:[#allocation2 + $0xc4] ss:$8 sps:$4 sm:$0xff]   ;;  %v1244_v0 = vcombine.high %v60_v61, %v60_v61  ;;  %v1747_v1 = vld [vmem:[%s1888_s0 + $0x10] sm:$0xff]  ;;  %v1552_v5 = vld [vmem:[#allocation2 + $0xc0] ss:$8 sps:$4 sm:$0xff]   ;;  %v1243_v19 = vcombine.low %v60_v61, %v60_v61  ;;  %v161_v61 = vlaneseq  ;;  %s1638_s16 = smov 16  }
  0x28   :  { %724 = vmatpush1.bf16.msra.mxu0 %v1448_v11  ;;  %v1248_v3 = vcombine.high %v1747_v1, %v1747_v1  ;;  %v1501_v4 = vld [vmem:[#allocation2 + $0x224] ss:$8 sps:$4 sm:$0xff]   ;;  %v1556_v6 = vld [vmem:[#allocation2 + $0xd4] ss:$8 sps:$4 sm:$0xff]   ;;  %v1499_v7 = vld [vmem:[#allocation2 + $0x220] ss:$8 sps:$4 sm:$0xff]  }
  0x29   :  { %725 = vmatprep.subr.bf16.mxu0 %v1449_v12  ;;  %681 = vmatpush1.bf16.msra.mxu1 %v1504_v32  ;;  %v1507_v8 = vld [vmem:[#allocation2 + $0x234] ss:$8 sps:$4 sm:$0xff]   ;;  %v1558_v9 = vld [vmem:[#allocation2 + $0xd0] ss:$8 sps:$4 sm:$0xff]   ;;  %v1562_v10 = vld [vmem:[#allocation2 + $0xe4] ss:$8 sps:$4 sm:$0xff]  }
  0x2a   :  { %682 = vmatprep.subr.bf16.mxu1 %v1508_v33  ;;  %704 = vmatprep.mubr.bf16.mxu1 %v1244_v0  ;;  %v1505_v11 = vld [vmem:[#allocation2 + $0x230] ss:$8 sps:$4 sm:$0xff]   ;;  %v1513_v12 = vld [vmem:[#allocation2 + $0x244] ss:$8 sps:$4 sm:$0xff]   ;;  %v1564_v13 = vld [vmem:[#allocation2 + $0xe0] ss:$8 sps:$4 sm:$0xff]  }
  0x2b   :  { %v1568_v14 = vld [vmem:[#allocation2 + $0xf4] ss:$8 sps:$4 sm:$0xff]   ;;  %v1581_v18 = vld [vmem:[%s1892_s4 + $0x40] sm:$0xff]   ;;  %v1517_v20 = vld [vmem:[#allocation2 + $0x250] ss:$8 sps:$4 sm:$0xff]   ;;  %vm1071_vm2 = vcmask 130048  }
  0x2c   :  { %726 = vmatpush1.bf16.msra.mxu0 %v1451_v15  ;;  %v1511_v15 = vld [vmem:[#allocation2 + $0x240] ss:$8 sps:$4 sm:$0xff]   ;;  %v1519_v17 = vld [vmem:[#allocation2 + $0x254] ss:$8 sps:$4 sm:$0xff]   ;;  %v1525_v22 = vld [vmem:[#allocation2 + $0x264] ss:$8 sps:$4 sm:$0xff]  }
  0x2d   :  { %727 = vmatprep.subr.bf16.mxu0 %v1452_v16  ;;  %683 = vmatpush1.bf16.msra.mxu1 %v1510_v36  ;;  %v1570_v16 = vld [vmem:[#allocation2 + $0xf0] ss:$8 sps:$4 sm:$0xff]   ;;  %v1583_v23 = vld [vmem:[%s1892_s4 + $0x48] sm:$0xff]   ;;  %v159_v0 = vld [vmem:[%s1891_s3] sm:$0x3]  ;;  %vm1206_vm3 = vcmask 7168  }
  0x2e   :  { %684 = vmatprep.subr.bf16.mxu1 %v1514_v37  ;;  %v1584_v25 = vld [vmem:[%s1892_s4 + $0x8] sm:$0xff]   ;;  %v1529_v28 = vld [vmem:[#allocation2 + $0x270] ss:$8 sps:$4 sm:$0xff]   ;;  %v1590_v37 = vld [vmem:[%s1892_s4 + $0x20] sm:$0xff]  }
  0x2f   :  { %v1586_v29 = vld [vmem:[%s1892_s4 + $0x10] sm:$0xff]   ;;  %v1535_v32 = vld [vmem:[#allocation2 + $0x280] ss:$8 sps:$4 sm:$0xff]   ;;  %v1588_v33 = vld [vmem:[%s1892_s4 + $0x18] sm:$0xff]  }
  0x30   :  { %728 = vmatpush1.bf16.msra.mxu0 %v1454_v21  ;;  %v1582_v21 = vld [vmem:[%s1892_s4] sm:$0xff]   ;;  %v1541_v36 = vld [vmem:[#allocation2 + $0x290] ss:$8 sps:$4 sm:$0xff]  }
  0x31   :  { %729 = vmatprep.subr.bf16.mxu0 %v1455_v24  ;;  %685 = vmatpush1.bf16.msra.mxu1 %v1516_v40  ;;  %v1523_v24 = vld [vmem:[#allocation2 + $0x260] ss:$8 sps:$4 sm:$0xff]   ;;  %v1555_v40 = vld [vmem:[#allocation2 + $0x2b4] ss:$8 sps:$4 sm:$0xff]  }
  0x32   :  { %686 = vmatprep.subr.bf16.mxu1 %v1520_v41  ;;  %v1553_v41 = vld [vmem:[#allocation2 + $0x2b0] ss:$8 sps:$4 sm:$0xff]  }
  0x34   :  { %730 = vmatpush1.bf16.msra.mxu0 %v1457_v26  ;;  %v1531_v26 = vld [vmem:[#allocation2 + $0x274] ss:$8 sps:$4 sm:$0xff]  }
  0x35   :  { %731 = vmatprep.subr.bf16.mxu0 %v1458_v27  ;;  %687 = vmatpush1.bf16.msra.mxu1 %v1522_v44  ;;  %v1585_v27 = vld [vmem:[%s1892_s4 + $0x50] sm:$0xff]  }
  0x36   :  { %688 = vmatprep.subr.bf16.mxu1 %v1526_v45  ;;  %v1567_v44 = vld [vmem:[#allocation2 + $0x2d4] ss:$8 sps:$4 sm:$0xff]   ;;  %v1565_v45 = vld [vmem:[#allocation2 + $0x2d0] ss:$8 sps:$4 sm:$0xff]  }
  0x38   :  { %732 = vmatpush1.bf16.msra.mxu0 %v1460_v30  ;;  %v1537_v30 = vld [vmem:[#allocation2 + $0x284] ss:$8 sps:$4 sm:$0xff]  }
  0x39   :  { %733 = vmatprep.subr.bf16.mxu0 %v1461_v31  ;;  %689 = vmatpush1.bf16.msra.mxu1 %v1528_v48  ;;  %v1587_v31 = vld [vmem:[%s1892_s4 + $0x58] sm:$0xff]  }
  0x3a   :  { %690 = vmatprep.subr.bf16.mxu1 %v1532_v49  ;;  %v1578_v48 = vld [vmem:[#allocation2 + $0x2f4] ss:$8 sps:$4 sm:$0xff]   ;;  %v1576_v49 = vld [vmem:[#allocation2 + $0x2f0] ss:$8 sps:$4 sm:$0xff]  }
  0x3c   :  { %734 = vmatpush1.bf16.msra.mxu0 %v1463_v34  ;;  %v1543_v34 = vld [vmem:[#allocation2 + $0x294] ss:$8 sps:$4 sm:$0xff]  }
  0x3d   :  { %735 = vmatprep.subr.bf16.mxu0 %v1464_v35  ;;  %691 = vmatpush1.bf16.msra.mxu1 %v1534_v52  ;;  %v1589_v35 = vld [vmem:[%s1892_s4 + $0x60] sm:$0xff]   ;;  %v1592_v52 = vld [vmem:[%s1892_s4 + $0x28] sm:$0xff]  }
  0x3e   :  { %692 = vmatprep.subr.bf16.mxu1 %v1538_v53  ;;  %v1593_v53 = vld [vmem:[%s1892_s4 + $0x70] sm:$0xff]  }
  0x40   :  { %736 = vmatpush1.bf16.msra.mxu0 %v1466_v38  ;;  %v1549_v38 = vld [vmem:[#allocation2 + $0x2a4] ss:$8 sps:$4 sm:$0xff]  }
  0x41   :  { %737 = vmatprep.subr.bf16.mxu0 %v1467_v39  ;;  %693 = vmatpush1.bf16.msra.mxu1 %v1540_v56  ;;  %v1547_v39 = vld [vmem:[#allocation2 + $0x2a0] ss:$8 sps:$4 sm:$0xff]   ;;  %v1596_v56 = vld [vmem:[%s1892_s4 + $0x38] sm:$0xff]  }
  0x42   :  { %694 = vmatprep.subr.bf16.mxu1 %v1544_v57 }
  0x44   :  { %738 = vmatpush1.bf16.msra.mxu0 %v1469_v42  ;;  %v1561_v42 = vld [vmem:[#allocation2 + $0x2c4] ss:$8 sps:$4 sm:$0xff]  }
  0x45   :  { %739 = vmatprep.subr.bf16.mxu0 %v1470_v43  ;;  %695 = vmatpush1.bf16.msra.mxu1 %v1546_v60  ;;  %v1559_v43 = vld [vmem:[#allocation2 + $0x2c0] ss:$8 sps:$4 sm:$0xff]  }
  0x46   :  { %696 = vmatprep.subr.bf16.mxu1 %v1550_v63 }
  0x48   :  { %740 = vmatpush1.bf16.msra.mxu0 %v1472_v46  ;;  %v1573_v46 = vld [vmem:[#allocation2 + $0x2e4] ss:$8 sps:$4 sm:$0xff]  }
  0x49   :  { %741 = vmatprep.subr.bf16.mxu0 %v1473_v47  ;;  %697 = vmatpush1.bf16.msra.mxu1 %v1552_v5  ;;  %v1571_v47 = vld [vmem:[#allocation2 + $0x2e0] ss:$8 sps:$4 sm:$0xff]  }
  0x4a   :  { %698 = vmatprep.subr.bf16.mxu1 %v1556_v6 }
  0x4c   :  { %742 = vmatpush1.bf16.msra.mxu0 %v1475_v50  ;;  %v1247_v50 = vcombine.low %v1747_v1, %v1747_v1 }
  0x4d   :  { %743 = vmatprep.subr.bf16.mxu0 %v1479_v51  ;;  %699 = vmatpush1.bf16.msra.mxu1 %v1558_v9  ;;  %v1591_v51 = vld [vmem:[%s1892_s4 + $0x68] sm:$0xff]  }
  0x4e   :  { %700 = vmatprep.subr.bf16.mxu1 %v1562_v10 }
  0x50   :  { %744 = vmatpush1.bf16.msra.mxu0 %v1481_v54  ;;  %v1594_v54 = vld [vmem:[%s1892_s4 + $0x30] sm:$0xff]  }
  0x51   :  { %754 = vmatprep.subr.bf16.mxu0 %v1489_v55  ;;  %701 = vmatpush1.bf16.msra.mxu1 %v1564_v13  ;;  %v1595_v55 = vld [vmem:[%s1892_s4 + $0x78] sm:$0xff]  }
  0x52   :  { %702 = vmatprep.subr.bf16.mxu1 %v1568_v14 }
  0x53   :  { %746 = vmatmul.mubr.bf16.vlgmr.msra.gmra.mrb[0].mxu0 %v1245_v58 }
  0x54   :  { %755 = vmatpush1.bf16.msra.mxu0 %v1487_v59  ;;  %786 = vmatprep.mubr.bf16.mxu0 %v1248_v3 }
  0x55   :  { %756 = vmatprep.subr.bf16.mxu0 %v1495_v62  ;;  %703 = vmatpush1.bf16.msra.mxu1 %v1570_v16  ;;  %v1801_v62 = vshrl.u32 %v161_v61, 7  ;;  %v1597_v16 = vld [vmem:[%s1894_s6] sm:$0xff]  }
  0x56   :  { %1374 = vmatprep.subr.bf16.mxu1 %v1581_v18  ;;  %v1598_v18 = vld [vmem:[%s1894_s6 + $0x8] sm:$0xff]  }
  0x57   :  { %v163_v63 = vsub.s32 0, %v1801_v62  ;;  %v167_v1 = vsub.s32 1, %v1801_v62 }
  0x58   :  { %757 = vmatpush1.bf16.msra.mxu0 %v1493_v2  ;;  %705 = vmatmul.mubr.bf16.vlgmr.msra.gmra.mrb[0].mxu1 %v1243_v19 }
  0x59   :  { %758 = vmatprep.subr.bf16.mxu0 %v1501_v4  ;;  %1375 = vmatpush3.bf16.msra.mxu1 %v1582_v21  ;;  %v164_v2 = vrot.slane %v159_v0, %v163_v63  ;;  %v168_v3 = vrot.slane %v159_v0, %v167_v1 }
  0x5a   :  { %1376 = vmatprep.subr.bf16.mxu1 %v1583_v23 }
  0x5c   :  { %759 = vmatpush1.bf16.msra.mxu0 %v1499_v7 }
  0x5d   :  { %760 = vmatprep.subr.bf16.mxu0 %v1507_v8  ;;  %1377 = vmatpush3.bf16.msra.mxu1 %v1584_v25 }
  0x5e   :  { %1378 = vmatprep.subr.bf16.mxu1 %v1585_v27 }
  0x60   :  { %761 = vmatpush1.bf16.msra.mxu0 %v1505_v11 }
  0x61   :  { %762 = vmatprep.subr.bf16.mxu0 %v1513_v12  ;;  %1379 = vmatpush3.bf16.msra.mxu1 %v1586_v29  ;;  %v1362_v29 = vld [vmem:[%s1895_s7] ss:$0 sm:$0xff] }
  0x62   :  { %1380 = vmatprep.subr.bf16.mxu1 %v1587_v31 }
  0x64   :  { %763 = vmatpush1.bf16.msra.mxu0 %v1511_v15 }
  0x65   :  { %764 = vmatprep.subr.bf16.mxu0 %v1519_v17  ;;  %1381 = vmatpush3.bf16.msra.mxu1 %v1588_v33  ;;  %v1635_v17 = vmov 0.0  }
  0x66   :  { %1382 = vmatprep.subr.bf16.mxu1 %v1589_v35 }
  0x68   :  { %765 = vmatpush1.bf16.msra.mxu0 %v1517_v20  ;;  %v1345_v20 = vld [vmem:[%s1893_s5] ss:$0 sm:$0xff]  ;;  %s1637_s5 = smov 112  }
  0x69   :  { %766 = vmatprep.subr.bf16.mxu0 %v1525_v22  ;;  %1383 = vmatpush3.bf16.msra.mxu1 %v1590_v37 }
  0x6a   :  { %1384 = vmatprep.subr.bf16.mxu1 %v1591_v51  ;;  %v1605_v51 = vld [vmem:[%s1898_s10 + $0x14] ss:$8 sps:$4 sm:$0xff]  }
  0x6c   :  { %767 = vmatpush1.bf16.msra.mxu0 %v1523_v24 }
  0x6d   :  { %768 = vmatprep.subr.bf16.mxu0 %v1531_v26  ;;  %1385 = vmatpush3.bf16.msra.mxu1 %v1592_v52  ;;  %v1603_v52 = vld [vmem:[%s1898_s10 + $0x10] ss:$8 sps:$4 sm:$0xff]  }
  0x6e   :  { %1386 = vmatprep.subr.bf16.mxu1 %v1593_v53  ;;  %v1639_v53 = vmov 0  }
  0x70   :  { %769 = vmatpush1.bf16.msra.mxu0 %v1529_v28  ;;  %v1599_v28 = vld [vmem:[%s1896_s8] sm:$0xff]  }
  0x71   :  { %770 = vmatprep.subr.bf16.mxu0 %v1537_v30  ;;  %1387 = vmatpush3.bf16.msra.mxu1 %v1594_v54 }
  0x72   :  { %1388 = vmatprep.subr.bf16.mxu1 %v1595_v55 }
  0x74   :  { %771 = vmatpush1.bf16.msra.mxu0 %v1535_v32 }
  0x75   :  { %772 = vmatprep.subr.bf16.mxu0 %v1543_v34  ;;  %1389 = vmatpush3.bf16.msra.mxu1 %v1596_v56  ;;  %v1366_v56 = vld [vmem:[%s1897_s9] ss:$0 sm:$0xff] }
  0x76   :  { %1401 = vmatprep.subr.bf16.mxu1 %v1635_v17 }
  0x78   :  { %773 = vmatpush1.bf16.msra.mxu0 %v1541_v36 }
  0x79   :  { %774 = vmatprep.subr.bf16.mxu0 %v1549_v38 }
  0x7c   :  { %775 = vmatpush1.bf16.msra.mxu0 %v1547_v39  ;;  %v1602_v39 = vld [vmem:[%s1898_s10 + $0x4] ss:$8 sps:$4 sm:$0xff]  }
  0x7d   :  { %776 = vmatprep.subr.bf16.mxu0 %v1555_v40  ;;  %v1048_v40 = vld [vmem:[%s1889_s1] sm:$0xff] }
  0x80   :  { %777 = vmatpush1.bf16.msra.mxu0 %v1553_v41 }
  0x81   :  { %778 = vmatprep.subr.bf16.mxu0 %v1561_v42 }
  0x84   :  { %779 = vmatpush1.bf16.msra.mxu0 %v1559_v43 }
  0x85   :  { %780 = vmatprep.subr.bf16.mxu0 %v1567_v44 }
  0x88   :  { %781 = vmatpush1.bf16.msra.mxu0 %v1565_v45 }
  0x89   :  { %782 = vmatprep.subr.bf16.mxu0 %v1573_v46  ;;  %v1600_v46 = vld [vmem:[%s1898_s10] ss:$8 sps:$4 sm:$0xff]  }
  0x8c   :  { %783 = vmatpush1.bf16.msra.mxu0 %v1571_v47 }
  0x8d   :  { %784 = vmatprep.subr.bf16.mxu0 %v1578_v48 }
  0x90   :  { %785 = vmatpush1.bf16.msra.mxu0 %v1576_v49 }
  0x93   :  { %787 = vmatmul.mubr.bf16.vlgmr.msra.gmra.mrb[0].mxu0 %v1247_v50 }
 0x12b   :  { %v706_v57 = vpop.f32.mrb[0].mxu1 }
 0x12c   :  { %v708_v58 = vpop.f32.mrb[1].mxu1  ;;  %v707_v4 = vadd.f32 %v706_v57, %v164_v2 }
 0x12d   :  { %v710_v59 = vpop.f32.mrb[2].mxu1  ;;  %v709_v5 = vadd.f32 %v708_v58, %v168_v3 }
 0x12e   :  { %v711_v60 = vpop.f32.mrb[3].mxu1 }
 0x166   :  { %v788_v6 = vpop.f32.mrb[0].mxu0 }
 0x167   :  { %v1416_v7 = vadd.f32 %v788_v6, %v707_v4  ;;  %v790_v8 = vpop.f32.mrb[1].mxu0 }
 0x168   :  { %v1418_v9 = vadd.f32 %v790_v8, %v709_v5  ;;  %v792_v10 = vpop.f32.mrb[2].mxu0  ;;  %v1121_v5 = vld [vmem:[%s1899_s11] sm:$0x3] }
 0x169   :  { %v1812_v11 = vmax.f32 %v1416_v7, 0.0  ;;  %v793_v12 = vpop.f32.mrb[3].mxu0  ;;  %v1126_v6 = vrot.slane %v1121_v5, %v163_v63  ;;  %v1130_v7 = vrot.slane %v1121_v5, %v167_v1 }
 0x16a   :  { %v1814_v13 = vmax.f32 %v1418_v9, 0.0 }
 0x16b   :  { %797 = vst [vmem:[%s1900_s12] sm:$0xff] %v1812_v11  ;;  %v799_v15 = vpack.c.bf16 %v1812_v11, %v1812_v11 }
 0x16c   :  { %798 = vst [vmem:[%s1900_s12 + $0x8] sm:$0xff] %v1814_v13  ;;  %v800_v14 = vpack.c.bf16 %v1814_v13, %v1814_v13 }
 0x16e   :  { %968 = vmatprep.mubr.bf16.mxu1 %v800_v14 }
 0x16f   :  { %969 = vmatmul.mubr.bf16.vlgmr.msra.gmra.mrb[4].mxu1 %v799_v15 }
 0x170   :  { %1402 = vmatpush3.bf16.msra.mxu1 %v1597_v16  ;;  %1405 = vmatprep.mubr.msk.bf16.mxu1 %vm1636_vm0, %v1635_v17 }
 0x171   :  { %1403 = vmatprep.subr.bf16.mxu1 %v1635_v17 }
 0x174   :  { %1404 = vmatpush3.bf16.msra.mxu1 %v1598_v18 }
 0x175   :  { %1409 = vmatprep.subr.bf16.mxu1 %v1635_v17 }
 0x242   :  { %v1390_v19 = vpop.f32.mrb[4].mxu1 }
 0x243   :  { %v1391_v21 = vpop.f32.mrb[5].mxu1 }
 0x244   :  { %v1392_v22 = vadd.f32 %v1391_v21, %v1390_v19  ;;  %v1393_v23 = vpop.f32.mrb[6].mxu1 }
 0x245   :  { %v1394_v24 = vpop.f32.mrb[7].mxu1 }
 0x246   :  { %v971_v25 = vadd.f32 %v1392_v22, %v1345_v20 }
 0x248   :  { %v976_v26 = vmax.f32 %v971_v25, 0.0 }
 0x24a   :  { %v977_v27 = vpack.c.bf16 %v976_v26, %v976_v26 }
 0x24c   :  { %1406 = vmatmul.mubr.msk.bf16.vlgmr.msra.gmra.mrb[8].mxu1 %vm1001_vm1, %v977_v27 }
 0x24d   :  { %1411 = vmatprep.mubr.msk.bf16.mxu1 %vm1636_vm0, %v1635_v17  ;;  %1410 = vmatpush3.bf16.msra.mxu1 %v1599_v28 }
 0x24e   :  { %1156 = vmatprep.subr.bf16.mxu1 %v1602_v39 }
 0x31f   :  { %v1039_v30 = vpop.f32.mrb[8].mxu1 }
 0x320   :  { %v1040_v31 = vadd.f32 %v1362_v29, %v1039_v30  ;;  %v1407_v32 = vpop.f32.mrb[9].mxu1 }
 0x321   :  { %v1042_v33 = vpop.f32.mrb[10].mxu1 }
 0x322   :  { %v1045_v34 = vmul.f32 0.5, %v1040_v31  ;;  %v1408_v35 = vpop.f32.mrb[11].mxu1  ;;  %v1210_v38 = vmul.f32 %v1040_v31, %v1040_v31  ;;  %v1209_v44 = vadd.f32 1.0, %v1040_v31 }
 0x324   :  { %v1046_v36 = vmul.f32 1.442695, %v1045_v34 }
 0x326   :  { %1606 = vpow2.f32 %v1046_v36 }
 0x330   :  { %v1607_v37 = vpop.eup %1606 }
 0x331   :  { %1050 = vrot.lane.b32.xlu0 %v1607_v37, %s1637_s5  ;;  %v1208_v49 = vmul.f32 %v1607_v37, %v1607_v37 }
 0x335   :  { %1212 = vrot.lane.b32.xlu0 %v1210_v38, %s1638_s16 }
 0x3a3   :  { %v1051_v41 = vpop.permute.xlu0 %1050 }
 0x3a4   :  { %v1053_v42 = vmul.f32 %v1051_v41, %v1048_v40 }
 0x3a6   :  { %v1054_v43 = vadd.f32 %v1053_v42, %v1040_v31 }
 0x3a7   :  { %v1213_v45 = vpop.permute.xlu0 %1212 }
 0x3a8   :  { %v1055_v47 = vpack.c.bf16 %v1054_v43, %v1054_v43  ;;  %v1215_v48 = vsub.f32 %v1209_v44, %v1213_v45 }
 0x3aa   :  { %1412 = vmatmul.mubr.msk.bf16.vlgmr.msra.gmra.mrb[12].mxu1 %vm1071_vm2, %v1055_v47  ;;  %v1216_v50 = vsub.f32 %v1215_v48, %v1208_v49 }
 0x3ab   :  { %1157 = vmatpush1.bf16.msra.mxu1 %v1600_v46  ;;  %1188 = vmatprep.mubr.bf16.mxu1 %v1639_v53 }
 0x3ac   :  { %1218 = vrot.lane.b32.xlu1 %v1216_v50, %s1637_s5  ;;  %1158 = vmatprep.subr.bf16.mxu1 %v1605_v51 }
 0x3af   :  { %1159 = vmatpush1.bf16.msra.mxu1 %v1603_v52 }
 0x41e   :  { %v1219_v54 = vpop.permute.xlu1 %1218 }
 0x41f   :  { %v1221_v55 = vsel %vm1071_vm2, %v1219_v54, 0.0 }
 0x420   :  { %1222 = vadd.xlane.f32.xlu1 %v1221_v55 }
 0x47d   :  { %v1109_v57 = vpop.f32.mrb[12].mxu1 }
 0x47e   :  { %v1110_v58 = vadd.f32 %v1366_v56, %v1109_v57  ;;  %v1413_v59 = vpop.f32.mrb[13].mxu1 }
 0x47f   :  { %v1112_v60 = vpop.f32.mrb[14].mxu1 }
 0x480   :  { %v1115_v61 = vmax.f32 %v1110_v58, 0.0  ;;  %v1414_v0 = vpop.f32.mrb[15].mxu1 }
 0x482   :  { %v1116_v2 = vpack.c.bf16 %v1115_v61, %v1115_v61 }
 0x484   :  { %1373 = vmatmul.mubr.msk.bf16.vlgmr.msra.gmra.mrb[16].mxu1 %vm1001_vm1, %v1116_v2 }
 0x4ad   :  { %v1223_v3 = vpop.xlane.xlu1 %1222 }
 0x4ae   :  { %v1224_v4 = vmul.f32 -0.5, %v1223_v3 }
 0x4b0   :  { %1225 = vst.msk [vmem:[%s1903_s15] sm:$0xff] %vm1206_vm3, %v1224_v4 }
 0x557   :  { %v1190_v8 = vpop.f32.mrb[16].mxu1 }
 0x558   :  { %v1191_v9 = vadd.f32 %v1190_v8, %v1126_v6  ;;  %v1192_v10 = vpop.f32.mrb[17].mxu1 }
 0x559   :  { %v1193_v12 = vadd.f32 %v1192_v10, %v1130_v7  ;;  %v1194_v14 = vpop.f32.mrb[18].mxu1 }
 0x55a   :  { %1197 = vst [vmem:[%s1901_s13] sm:$0xff] %v1191_v9  ;;  %v1199_v15 = vsub.f32 %v1191_v9, %v1812_v11  ;;  %v1195_v16 = vpop.f32.mrb[19].mxu1 }
 0x55b   :  { %1198 = vst [vmem:[%s1901_s13 + $0x8] sm:$0xff] %v1193_v12  ;;  %v1200_v63 = vsub.f32 %v1193_v12, %v1814_v13 }
 0x55c   :  { %v1201_v62 = vmul.f32 %v1199_v15, %v1199_v15 }
 0x55d   :  { %v1202_v1 = vmul.f32 %v1200_v63, %v1200_v63 }
 0x55f   :  { %v1203_v17 = vadd.f32 %v1202_v1, %v1201_v62 }
 0x561   :  { %1204 = vadd.xlane.f32.xlu0 %v1203_v17 }
 0x5ee   :  { %v1205_v18 = vpop.xlane.xlu0 %1204 }
 0x5ef   :  { %1207 = vst.msk [vmem:[%s1902_s14] sm:$0xff] %vm1206_vm3, %v1205_v18 }
 0x5f0   :  { %1242 = vsyncpa [#allocation3], 1 }

</bundles_post_ra>
